<compile_context>
chip_gen: v7x
topology: tpu7x:2x2x1
jax: 0.10.0
libtpu: 0.0.40
codegen_flags: <defaults>
</compile_context>

<pallas_src>
import jax
import jax.numpy as jnp
from jax.experimental import pallas as pl
from jax.experimental.pallas import tpu as pltpu

_LANES = 128
_BLOCK_ROWS = 2048   # 2048x128 edges/block: in+out streams ~25 B/edge ->
                     # ~6.25 MiB/block, ~12.5 MiB double-buffered.


def _mask_edges_kernel(ei_ref, w_ref, keep_ref, ei_out_ref, w_out_ref):
    """Dense tiles: dropped edges -> index -1, weight 0.

    ei_ref/ei_out_ref: (2, tr, 128) int32; w_ref/w_out_ref: (1, tr, 128) f32;
    keep_ref: (1, tr, 128) int8 (broadcast over the src/dst axis).
    """
    keep = keep_ref[...] != 0
    ei_out_ref[...] = jnp.where(keep, ei_ref[...], jnp.int32(-1))
    w_out_ref[...] = jnp.where(keep, w_ref[...], jnp.float32(0.0))


def _apply_keep_mask(edge_index, edge_weight, keep_padded, E):
    """Pallas hot path over all E edges, edge axis laid out as (rows, 128)."""
    rows = pl.cdiv(E, _LANES)
    e_pad = rows * _LANES
    pad = e_pad - E

    ei, w = edge_index, edge_weight
    if pad:
        # Only hit when E % 128 != 0: pads <=127 trailing edges (one small
        # copy of the index/weight streams); the aligned case is copy-free.
        ei = jnp.pad(ei, ((0, 0), (0, pad)), constant_values=-1)
        w = jnp.pad(w, (0, pad))
    ei3 = ei.reshape(2, rows, _LANES)
    w3 = w.reshape(1, rows, _LANES)
    keep3 = keep_padded.reshape(1, rows, _LANES)

    tr = min(_BLOCK_ROWS, rows)            # == rows (full dim) or multiple of 8
    grid = (pl.cdiv(rows, tr),)            # ragged trailing block handled by Pallas
    ei_spec = pl.BlockSpec((2, tr, _LANES), lambda i: (0, i, 0))
    v_spec = pl.BlockSpec((1, tr, _LANES), lambda i: (0, i, 0))

    ei_o, w_o = pl.pallas_call(
        _mask_edges_kernel,
        out_shape=(
            jax.ShapeDtypeStruct((2, rows, _LANES), jnp.int32),
            jax.ShapeDtypeStruct((1, rows, _LANES), jnp.float32),
        ),
        grid=grid,
        in_specs=[ei_spec, v_spec, v_spec],
        out_specs=(ei_spec, v_spec),
        compiler_params=pltpu.CompilerParams(
            dimension_semantics=("parallel",),        # megacore-shards on v7x
            vmem_limit_bytes=32 * 1024 * 1024),       # fits v5e/v6e/v7x physical
        cost_estimate=pl.CostEstimate(
            flops=0, transcendentals=0,
            bytes_accessed=e_pad * 25),               # ~25 B/edge, HBM-bound
    )(ei3, w3, keep3)

    ei_m = ei_o.reshape(2, e_pad)[:, :E]   # no-op when E % 128 == 0
    w_m = w_o.reshape(e_pad)[:E]
    return ei_m, w_m


def drop_path(edge_index, edge_weight=None, *, r=0.5, walks_per_node=2,
              walk_length=4, p=1.0, q=1.0, num_nodes=None, by='degree',
              training=True, key=None):
    """Pallas DropPath.

    Returns (edge_index_out (2,E), edge_weight_out (E,), num_kept).  Dropped
    edges are masked in place: index -1, weight 0.  Kept edges keep their
    original position and values.
    """
    if not (0.0 <= float(r) <= 1.0):
        raise ValueError(f"Root-node ratio has to be between 0 and 1, got {r}")
    if by not in ('degree', 'uniform'):
        raise ValueError(f"Unknown sampling strategy: {by}")

    E = edge_index.shape[1]
    edge_index = edge_index.astype(jnp.int32)
    if edge_weight is None:
        edge_weight = jnp.ones((E,), dtype=jnp.float32)
    edge_weight = edge_weight.astype(jnp.float32)

    if (not training) or r == 0.0 or E == 0 or walks_per_node <= 0 or walk_length <= 0:
        return edge_index, edge_weight, jnp.int32(E)

    if num_nodes is None:
        # int(jnp.max(edge_index)) + 1 would force a device->host sync and
        # block jit of the surrounding pipeline; require the static count.
        raise ValueError("num_nodes must be provided when training with r > 0")

    num_start = int(round(float(r) * num_nodes))
    if num_start == 0:
        return edge_index, edge_weight, jnp.int32(E)

    if key is None:
        key = jax.random.PRNGKey(0)
    k_start, k_walk = jax.random.split(key)

    row, col = edge_index[0], edge_index[1]

    # ---- CSR build + root sampling + uniform random walks (plain JAX) ----
    # TODO(synk): torch_cluster.random_walk (and node2vec bias p, q != 1) has
    # no clean Pallas equivalent; walks are uniform (the module's defaults are
    # p = q = 1) and this O(walkers*walk_length) scalar-gather work stays in
    # plain JAX.
    perm = jnp.argsort(row, stable=True).astype(jnp.int32)   # edge id per CSR slot
    col_sorted = col[perm]
    deg = jnp.zeros((num_nodes,), jnp.int32).at[row].add(1)
    rowptr = jnp.concatenate(
        [jnp.zeros((1,), jnp.int32), jnp.cumsum(deg).astype(jnp.int32)])

    if by == 'degree':
        logits = jnp.log(deg.astype(jnp.float32) + 1e-12)    # prob ~ out-degree
        start = jax.random.categorical(k_start, logits, shape=(num_start,))
    else:  # 'uniform'
        start = jax.random.permutation(k_start, num_nodes)[:num_start]
    start = jnp.tile(start.astype(jnp.int32), walks_per_node)
    n_walkers = start.shape[0]

    e_pad = pl.cdiv(E, _LANES) * _LANES
    sentinel = jnp.int32(e_pad)           # "no edge": OOB -> dropped by scatter

    def walk_step(cur, k):
        d = deg[cur]                                          # (W,)
        u = jax.random.uniform(k, (n_walkers,))
        off = jnp.minimum((u * d.astype(jnp.float32)).astype(jnp.int32),
                          jnp.maximum(d - 1, 0))
        pos = jnp.clip(rowptr[cur] + off, 0, E - 1)
        has = d > 0
        nxt = jnp.where(has, col_sorted[pos], cur)
        eid = jnp.where(has, perm[pos], sentinel)
        return nxt, eid

    cur = start
    walk_eids = []
    for k in jax.random.split(k_walk, walk_length):
        cur, eid = walk_step(cur, k)
        walk_eids.append(eid)
    walk_eids = jnp.concatenate(walk_eids)

    # keep[e] = 0 iff edge e was traversed by some walk.  Built as int8 and
    # directly at the lane-padded length so the kernel needs no pad pass for it.
    keep = jnp.ones((e_pad,), jnp.int8).at[walk_eids].set(jnp.int8(0), mode='drop')
    num_kept = jnp.sum(keep[:E].astype(jnp.int32))

    # ---- Pallas hot path: mask edge_index / edge_weight over all E edges ----
    ei_m, w_m = _apply_keep_mask(edge_index, edge_weight, keep, E)

    # TODO(synk): a true dynamic-shape (2, E_kept) output is impossible under
    # XLA/Pallas; callers filter with num_kept (or edge_index_out[0] >= 0).
    return ei_m, w_m, num_kept


if __name__ == "__main__":
    key = jax.random.PRNGKey(0)
    k1, k2, k3 = jax.random.split(key, 3)

    num_nodes = 32
    E = 256  # number of edges

    edge_index = jax.random.randint(k1, (2, E), 0, num_nodes, dtype=jnp.int32)
    edge_weight = jax.random.uniform(k2, (E,), dtype=jnp.float32)

    ei_out, w_out, num_kept = drop_path(
        edge_index, edge_weight, r=0.5, walks_per_node=2, walk_length=4,
        p=1.0, q=1.0, num_nodes=num_nodes, by='degree', training=True, key=k3)
    jax.block_until_ready((ei_out, w_out, num_kept))

    n = int(num_kept)
    assert ei_out.shape == (2, E) and w_out.shape == (E,)
    assert 0 < n < E                        # some (but not all) edges dropped
    assert E - n <= 2 * 16 * 4              # at most walkers * walk_length drops

    kept = ei_out[0] >= 0
    assert int(kept.sum()) == n
    # kept edges are untouched
    assert bool(jnp.all(jnp.where(kept, ei_out[0] == edge_index[0], True)))
    assert bool(jnp.all(jnp.where(kept, ei_out[1] == edge_index[1], True)))
    assert bool(jnp.all(jnp.where(kept, w_out == edge_weight, True)))
    # dropped edges are fully masked out
    assert bool(jnp.all(jnp.where(kept, True, ei_out[1] == -1)))
    assert bool(jnp.all(jnp.where(kept, True, w_out == 0.0)))

    # Eval mode is the identity (like the PyTorch module with training=False).
    ei_eval, w_eval, n_eval = drop_path(edge_index, edge_weight, training=False)
    assert int(n_eval) == E
    assert bool(jnp.all(ei_eval == edge_index))
    assert bool(jnp.all(w_eval == edge_weight))

    print("KERNEL_OK")
</pallas_src>

<mosaic_0001>
module attributes {stable_mosaic.version = 11 : i64} {
  func.func @_mask_edges_kernel(%arg0: i32, %arg1: memref<2x2x128xi32, #tpu.memory_space<vmem>>, %arg2: memref<1x2x128xf32, #tpu.memory_space<vmem>>, %arg3: memref<1x2x128xi8, #tpu.memory_space<vmem>>, %arg4: memref<2x2x128xi32, #tpu.memory_space<vmem>>, %arg5: memref<1x2x128xf32, #tpu.memory_space<vmem>>) attributes {dimension_semantics = [#tpu.dimension_semantics<parallel>], iteration_bounds = array<i64: 1>, scalar_prefetch = 0 : i64, scratch_operands = 0 : i64, tpu.core_type = #tpu.core_type<tc>, window_params = [{transform_indices = @transform_0, window_bounds = array<i64: 2, 2, 128>}, {transform_indices = @transform_1, window_bounds = array<i64: 1, 2, 128>}, {transform_indices = @transform_2, window_bounds = array<i64: 1, 2, 128>}, {transform_indices = @transform_3, window_bounds = array<i64: 2, 2, 128>}, {transform_indices = @transform_4, window_bounds = array<i64: 1, 2, 128>}]} {
    %c0 = arith.constant 0 : index
    %c0_0 = arith.constant 0 : index
    %c0_1 = arith.constant 0 : index
    %0 = vector.load %arg3[%c0, %c0_0, %c0_1] : memref<1x2x128xi8, #tpu.memory_space<vmem>>, vector<1x2x128xi8>
    %c0_i8 = arith.constant 0 : i8
    %1 = vector.broadcast %c0_i8 : i8 to vector<1x2x128xi8>
    %2 = arith.cmpi ne, %0, %1 : vector<1x2x128xi8>
    %c0_2 = arith.constant 0 : index
    %c0_3 = arith.constant 0 : index
    %c0_4 = arith.constant 0 : index
    %3 = vector.load %arg1[%c0_2, %c0_3, %c0_4] : memref<2x2x128xi32, #tpu.memory_space<vmem>>, vector<2x2x128xi32>
    %c-1_i32 = arith.constant -1 : i32
    %4 = vector.shape_cast %2 : vector<1x2x128xi1> to vector<1x2x128xi1>
    %5 = vector.broadcast %4 : vector<1x2x128xi1> to vector<2x2x128xi1>
    %6 = vector.broadcast %c-1_i32 : i32 to vector<2x2x128xi32>
    %7 = arith.select %5, %3, %6 : vector<2x2x128xi1>, vector<2x2x128xi32>
    %c0_5 = arith.constant 0 : index
    %c0_6 = arith.constant 0 : index
    %c0_7 = arith.constant 0 : index
    %8 = vector.load %arg4[%c0_5, %c0_6, %c0_7] : memref<2x2x128xi32, #tpu.memory_space<vmem>>, vector<2x2x128xi32>
    tpu.vector_store %arg4[%c0_5, %c0_6, %c0_7], %7 {strides = array<i32>} : memref<2x2x128xi32, #tpu.memory_space<vmem>>, vector<2x2x128xi32>,
    %c0_8 = arith.constant 0 : index
    %c0_9 = arith.constant 0 : index
    %c0_10 = arith.constant 0 : index
    %9 = vector.load %arg2[%c0_8, %c0_9, %c0_10] : memref<1x2x128xf32, #tpu.memory_space<vmem>>, vector<1x2x128xf32>
    %cst = arith.constant 0.000000e+00 : f32
    %10 = vector.broadcast %cst : f32 to vector<1x2x128xf32>
    %11 = arith.select %2, %9, %10 : vector<1x2x128xi1>, vector<1x2x128xf32>
    %c0_11 = arith.constant 0 : index
    %c0_12 = arith.constant 0 : index
    %c0_13 = arith.constant 0 : index
    %12 = vector.load %arg5[%c0_11, %c0_12, %c0_13] : memref<1x2x128xf32, #tpu.memory_space<vmem>>, vector<1x2x128xf32>
    tpu.vector_store %arg5[%c0_11, %c0_12, %c0_13], %11 {strides = array<i32>} : memref<1x2x128xf32, #tpu.memory_space<vmem>>, vector<1x2x128xf32>,
    return
  }
  func.func @transform_0(%arg0: i32) -> (i32, i32, i32) {
    %c0_i32 = arith.constant 0 : i32
    %c0_i32_0 = arith.constant 0 : i32
    %c0_i32_1 = arith.constant 0 : i32
    return %c0_i32, %arg0, %c0_i32_0 : i32, i32, i32
  }
  func.func @transform_1(%arg0: i32) -> (i32, i32, i32) {
    %c0_i32 = arith.constant 0 : i32
    %c0_i32_0 = arith.constant 0 : i32
    %c0_i32_1 = arith.constant 0 : i32
    return %c0_i32, %arg0, %c0_i32_0 : i32, i32, i32
  }
  func.func @transform_2(%arg0: i32) -> (i32, i32, i32) {
    %c0_i32 = arith.constant 0 : i32
    %c0_i32_0 = arith.constant 0 : i32
    %c0_i32_1 = arith.constant 0 : i32
    return %c0_i32, %arg0, %c0_i32_0 : i32, i32, i32
  }
  func.func @transform_3(%arg0: i32) -> (i32, i32, i32) {
    %c0_i32 = arith.constant 0 : i32
    %c0_i32_0 = arith.constant 0 : i32
    %c0_i32_1 = arith.constant 0 : i32
    return %c0_i32, %arg0, %c0_i32_0 : i32, i32, i32
  }
  func.func @transform_4(%arg0: i32) -> (i32, i32, i32) {
    %c0_i32 = arith.constant 0 : i32
    %c0_i32_0 = arith.constant 0 : i32
    %c0_i32_1 = arith.constant 0 : i32
    return %c0_i32, %arg0, %c0_i32_0 : i32, i32, i32
  }
}

</mosaic_0001>

<bundles_post_ra>
// kernel: tpu_custom_call.1
= control target key start
LH: loop header
LB: loop body
LE: loop exit
PB: predicated region body
PF: predicated region fallthrough
CT: control target
= control target key end

     0   :  { %10 = vsyncpa [#allocation3], 0  ;;  %s245_s0 = inlined_call_operand.hbm [shape: s32[2,2,128], index: 0, kind: input, shape index: {}]   ;;  %s246_s1 = inlined_call_operand.vmem [shape: f32[1,2,128], index: 1, kind: input, shape index: {}]   ;;  %s247_s2 = inlined_call_operand.vmem [shape: s8[1,2,128], index: 2, kind: input, shape index: {}]   ;;  %s248_s3 = inlined_call_operand.hbm [shape: s32[2,2,128], index: 3, kind: output, shape index: {0}]   ;;  %s249_s4 = inlined_call_operand.hbm [shape: f32[1,2,128], index: 4, kind: output, shape index: {1}]  }
   0x1   :  { %11 = vsyncpa [#allocation4], 0 }
   0x2   :  { %12 = vsyncpa [#allocation7], 0  ;;  %s159_s15 = smov [#allocation2]   ;;  %s87_s19 = scalar_lea.hbm %s245_s0, 64 }
   0x3   :  { %s18_s16 = sshll.u32 %s159_s15, 4  ;;  %p88_p0 = scmp.ne.s32.totalorder %s245_s0, %s87_s19  ;;  %s19_s16 = int_to_ptr.vmem [resolvable:$true] %s18_s16 }
   0x4   :  { %p91_p1 = scmp.lt.u32.totalorder %s87_s19, %s245_s0 }
   0x6   :  { %p93_p2 = pnand %p91_p1, %p88_p0 }
   0x8   :  { %96 = shalt.err (!%p93_p2)
}
   0x9   :  { %s97_s24 = scalar_lea.vmem %s19_s16, 64  ;;  %p102_p4 = scmp.lt.s32.totalorder %s19_s16, %s19_s16 }
   0xa   :  { %p98_p3 = scmp.ne.s32.totalorder %s19_s16, %s97_s24  ;;  %p103_p5 = scmp.lt.s32.totalorder %s97_s24, %s97_s24 }
   0xc   :  { %p104_p6 = por %p103_p5, %p102_p4 }
   0xe   :  { %p105_p7 = pnand %p104_p6, %p98_p3 }
  0x10   :  { %108 = shalt.err (!%p105_p7)
}
  0x11   :  { %s160_s25 = smov 32   ;;  %s161_s26 = smov 2  }
  0x12   :  { %24 = dma.hbm_to_vmem [thread:$0]  %s245_s0, 64, %s19_s16, [#allocation3], %s160_s25, %s160_s25, %s161_s26  }
  0x13   :  { %153 = dma.done.wait [#allocation3], 64  }
  0x14   :  { %154 = vsyncadd [#allocation3], 4294967232  ;;  %v34_v0 = vld [vmem:[%s247_s2] sm:$0x1]  ;;  %v162_v1 = vmov 0   ;;  %s163_s5 = smov [#allocation5]  }
  0x15   :  { %vm35_vm0 = vnez %v34_v0  ;;  %s55_s6 = sshll.u32 %s163_s5, 4  ;;  %s164_s7 = smov [#allocation6]   ;;  %v36_v3 = vld [vmem:[#allocation2] sm:$0x3]  ;;  %v37_v5 = vld [vmem:[#allocation2 + $0x2] sm:$0x3]  ;;  %s56_s6 = int_to_ptr.vmem [resolvable:$true] %s55_s6 }
  0x16   :  { %v38_v2 = vsel %vm35_vm0, 16843009, %v162_v1  ;;  %s68_s8 = sshll.u32 %s164_s7, 4  ;;  %v47_v6 = vld [vmem:[%s246_s1] sm:$0x3]  ;;  %s109_s0 = scalar_lea.vmem %s56_s6, 64  ;;  %s211_s8 = int_to_ptr.vmem [resolvable:$true] %s68_s8 }
  0x17   :  { %v39_v4 = vunpack.c.0.s8 %v38_v2  ;;  %p110_p8 = scmp.ne.s32.totalorder %s56_s6, %s109_s0  ;;  %p114_p9 = scmp.lt.s32.totalorder %s56_s6, %s56_s6 }
  0x18   :  { %p115_p10 = scmp.lt.s32.totalorder %s109_s0, %s109_s0 }
  0x19   :  { %vm40_vm1 = vcmp.ne.s32.totalorder %v39_v4, 0 }
  0x1a   :  { %v43_v7 = vsel %vm40_vm1, %v36_v3, 4294967295  ;;  %v44_v8 = vsel %vm40_vm1, %v37_v5, 4294967295  ;;  %v48_v9 = vsel %vm40_vm1, %v47_v6, 0.0  ;;  %p116_p11 = por %p115_p10, %p114_p9 }
  0x1b   :  { %45 = vst [vmem:[#allocation5] sm:$0x3] %v43_v7  ;;  %46 = vst [vmem:[#allocation5 + $0x2] sm:$0x3] %v44_v8 }
  0x1c   :  { %49 = vst [vmem:[#allocation6] sm:$0x3] %v48_v9  ;;  %p117_p12 = pnand %p116_p11, %p110_p8 }
  0x1e   :  { %120 = shalt.err (!%p117_p12)
}
  0x1f   :  { %s121_s1 = scalar_lea.hbm %s248_s3, 64 }
  0x20   :  { %p122_p13 = scmp.ne.s32.totalorder %s248_s3, %s121_s1  ;;  %p125_p0 = scmp.lt.u32.totalorder %s121_s1, %s248_s3 }
  0x22   :  { %p127_p1 = pnand %p125_p0, %p122_p13 }
  0x24   :  { %130 = shalt.err (!%p127_p1)
}
  0x25   :  { %61 = dma.vmem_to_hbm [thread:$0]  %s56_s6, 64, %s248_s3, [#allocation4], %s160_s25, %s160_s25, %s161_s26  }
  0x26   :  { %s131_s18 = scalar_lea.vmem %s211_s8, 32  ;;  %p136_p3 = scmp.lt.s32.totalorder %s211_s8, %s211_s8 }
  0x27   :  { %p132_p2 = scmp.ne.s32.totalorder %s211_s8, %s131_s18  ;;  %p137_p4 = scmp.lt.s32.totalorder %s131_s18, %s131_s18 }
  0x29   :  { %p138_p5 = por %p137_p4, %p136_p3 }
  0x2b   :  { %p139_p6 = pnand %p138_p5, %p132_p2 }
  0x2d   :  { %142 = shalt.err (!%p139_p6)
}
  0x2e   :  { %s143_s21 = scalar_lea.hbm %s249_s4, 32 }
  0x2f   :  { %p144_p7 = scmp.ne.s32.totalorder %s249_s4, %s143_s21  ;;  %p147_p8 = scmp.lt.u32.totalorder %s143_s21, %s249_s4 }
  0x31   :  { %p149_p9 = pnand %p147_p8, %p144_p7 }
  0x33   :  { %152 = shalt.err (!%p149_p9)
}
  0x34   :  { %71 = dma.vmem_to_hbm [thread:$0]  %s211_s8, 32, %s249_s4, [#allocation7]  }
  0x35   :  { %155 = dma.done.wait [#allocation4], 64  }
  0x36   :  { %156 = vsyncadd [#allocation4], 4294967232 }
  0x37   :  { %157 = dma.done.wait [#allocation7], 32  }
  0x38   :  { %158 = vsyncadd [#allocation7], 4294967264 }
  0x39   :  { %78 = vsyncpa [#allocation3], 1 }
  0x3a   :  { %79 = vsyncpa [#allocation4], 1 }
  0x3b   :  { %80 = vsyncpa [#allocation7], 1 }

</bundles_post_ra>
